<compile_context>
chip_gen: v6e
topology: v6e:2x2x1
jax: 0.10.0
libtpu: 0.0.40
codegen_flags: <defaults>
</compile_context>

<pallas_src>
import functools

import jax
import jax.numpy as jnp
from jax.experimental import pallas as pl
from jax.experimental.pallas import tpu as pltpu


def _round_up(x: int, m: int) -> int:
    return ((x + m - 1) // m) * m


def _min_sublane(dtype) -> int:
    """Minimum sublane multiple for a dtype's (sublane, 128) tile."""
    itemsize = jnp.dtype(dtype).itemsize
    return {4: 8, 2: 16, 1: 32}.get(itemsize, 8)


def _integer_power(x, n: int):
    """x ** n for a static non-negative integer n as a multiply chain (VPU only)."""
    if n == 0:
        return jnp.ones_like(x)
    acc = None
    base = x
    while n > 0:
        if n & 1:
            acc = base if acc is None else acc * base
        n >>= 1
        if n > 0:
            base = base * base
    return acc


def _focal_elementwise(pred, tgt, *, alpha: float, gamma: float, with_logits: bool):
    """Per-element focal loss in f32 (exact for hard {0,1} targets)."""
    p = pred.astype(jnp.float32)
    t = tgt.astype(jnp.float32)

    if with_logits:
        # bce = BCEWithLogits(x, t) = softplus(z) with z = (1-2t)*x  (t in {0,1}).
        z = (1.0 - 2.0 * t) * p
        e = jnp.exp(-jnp.abs(z))                      # 1 EUP, reused twice
        bce = jnp.maximum(z, 0.0) + jnp.log1p(e)      # 1 EUP
        inv = 1.0 / (1.0 + e)                         # ~1 EUP (exact divide)
        one_minus_pt = jnp.where(z >= 0.0, inv, e * inv)   # sigmoid(z) = 1 - pt
    else:
        # BCELoss with PyTorch's clamp of the log term at -100; for {0,1}
        # targets the two clamped logs collapse to a single log of pt.
        pt = t * p + (1.0 - t) * (1.0 - p)            # == exp(-bce) for hard t
        bce = -jnp.maximum(jnp.log(pt), -100.0)       # 1 EUP
        one_minus_pt = 1.0 - pt

    alpha_t = alpha * t + (1.0 - alpha) * (1.0 - t)

    if float(gamma).is_integer() and 0 <= gamma <= 32:
        mod = _integer_power(one_minus_pt, int(gamma))          # no EUP
    else:
        # x ** gamma via exp(gamma*log(x)); map x == 0 explicitly to 0 to avoid
        # 0 * (-inf) -> nan.  gamma > 0 here (integer 0 handled above).
        safe = jnp.maximum(one_minus_pt, jnp.float32(1e-38))
        mod = jnp.where(one_minus_pt > 0.0,
                        jnp.exp(gamma * jnp.log(safe)),
                        jnp.float32(0.0))

    return alpha_t * mod * bce


def _elementwise_kernel(pred_ref, tgt_ref, out_ref, *, alpha, gamma, with_logits):
    focal = _focal_elementwise(pred_ref[...], tgt_ref[...],
                               alpha=alpha, gamma=gamma, with_logits=with_logits)
    out_ref[...] = focal.astype(out_ref.dtype)


def _reduce_kernel(pred_ref, tgt_ref, partial_ref, *, alpha, gamma, with_logits,
                   rows_total, block_rows, needs_mask):
    focal = _focal_elementwise(pred_ref[...], tgt_ref[...],
                               alpha=alpha, gamma=gamma, with_logits=with_logits)
    if needs_mask:
        # Zero the garbage rows of a partial last block (OOB DMA padding).
        row = (pl.program_id(0) * block_rows
               + jax.lax.broadcasted_iota(jnp.int32, focal.shape, 0))
        focal = jnp.where(row < rows_total, focal, jnp.float32(0.0))

    prow = partial_ref.shape[0]                    # 8 (or tb when tb < 8)
    m = focal.shape[0] // prow
    chunks = [focal[i * prow:(i + 1) * prow, :] for i in range(m)]
    # Pairwise tree reduction: log2(m) dependent levels instead of an m-deep
    # serial add chain, so the 4 VALU slots can co-issue.
    while len(chunks) > 1:
        nxt = [chunks[i] + chunks[i + 1] for i in range(0, len(chunks) - 1, 2)]
        if len(chunks) % 2:
            nxt.append(chunks[-1])
        chunks = nxt
    partial_ref[...] = chunks[0]


def binary_focal_loss(prediction, target, *, alpha=0.25, gamma=2.0,
                      reduction="mean", with_logits=False,
                      max_rows_per_block=4096):
    """Pallas implementation of gravitorch `_BinaryFocalLoss.forward`."""
    if prediction.shape != target.shape or prediction.ndim != 2:
        raise ValueError("prediction/target must be 2-D (batch, num_classes) and match")
    if not (0.0 <= alpha <= 1.0):
        raise ValueError(f"Incorrect parameter alpha ({alpha}). The valid range of value is [0, 1].")
    if gamma < 0:
        raise ValueError(f"Incorrect parameter gamma ({gamma}). Gamma has to be positive (>=0).")
    if reduction not in ("none", "mean", "sum"):
        raise ValueError(f"Incorrect reduction: {reduction}")
    if max_rows_per_block < 1:
        raise ValueError("max_rows_per_block must be >= 1")

    B, C = prediction.shape
    N = B * C
    sub = max(_min_sublane(prediction.dtype), _min_sublane(target.dtype))

    # --- Block-row selection: no data movement, just tiling of the original
    # (B, C) layout.  Block shape is (tb, C): last dim == full array dim.
    if B <= sub:
        tb = B                                        # full first dim (allowed)
    else:
        B_r = _round_up(B, sub)
        max_rows = max(sub, _round_up(max_rows_per_block, sub))
        # Keep a block at ~<=2 MiB of f32-equivalent data (fits default scoped
        # VMEM with double-buffered inputs + f32 temporaries on all gens).
        budget_rows = max(sub, ((2 * 1024 * 1024) // max(C * 4, 1)) // sub * sub)
        tb = min(max_rows, B_r, budget_rows)
        # v7x megacore: aim for >= 4 row blocks when blocks stay >= 512 rows.
        if B_r >= 4 * 512:
            tb = min(tb, max(512, _round_up(pl.cdiv(B_r, 4), sub)))
        tb = max(tb, sub)
    grid = pl.cdiv(B, tb)

    in_specs = [pl.BlockSpec((tb, C), lambda i: (i, 0)),
                pl.BlockSpec((tb, C), lambda i: (i, 0))]
    cparams = pltpu.CompilerParams(
        dimension_semantics=("parallel",),            # no cross-step state
        vmem_limit_bytes=32 * 1024 * 1024,
    )

    if reduction == "none":
        kernel = functools.partial(_elementwise_kernel, alpha=float(alpha),
                                   gamma=float(gamma), with_logits=bool(with_logits))
        # Output is written directly in the final (B, C) layout: OOB rows of a
        # partial last block are dropped by Pallas, so no un-pad copy is needed.
        return pl.pallas_call(
            kernel,
            out_shape=jax.ShapeDtypeStruct((B, C), prediction.dtype),
            grid_spec=pltpu.PrefetchScalarGridSpec(
                num_scalar_prefetch=0,
                grid=(grid,),
                in_specs=in_specs,
                out_specs=pl.BlockSpec((tb, C), lambda i: (i, 0)),
            ),
            compiler_params=cparams,
        )(prediction, target)

    # 'sum' / 'mean': reduction-only kernel -- no dense HBM writeback.
    prow = 8 if tb % 8 == 0 else tb
    needs_mask = (B % tb) != 0
    kernel = functools.partial(_reduce_kernel, alpha=float(alpha), gamma=float(gamma),
                               with_logits=bool(with_logits), rows_total=B,
                               block_rows=tb, needs_mask=needs_mask)
    partials = pl.pallas_call(
        kernel,
        out_shape=jax.ShapeDtypeStruct((grid * prow, C), jnp.float32),
        grid_spec=pltpu.PrefetchScalarGridSpec(
            num_scalar_prefetch=0,
            grid=(grid,),
            in_specs=in_specs,
            out_specs=pl.BlockSpec((prow, C), lambda i: (i, 0)),
        ),
        compiler_params=cparams,
    )(prediction, target)
    total = jnp.sum(partials)
    if reduction == "sum":
        return total.astype(prediction.dtype)
    return (total / N).astype(prediction.dtype)       # 'mean' divides by B*C


def _reference(prediction, target, *, alpha, gamma, reduction, with_logits):
    """Faithful JAX port of the PyTorch module (pt = exp(-bce))."""
    p = prediction.astype(jnp.float32)
    t = target.astype(jnp.float32)
    if with_logits:
        bce = jnp.maximum(p, 0.0) - p * t + jnp.log1p(jnp.exp(-jnp.abs(p)))
    else:
        bce = -(t * jnp.maximum(jnp.log(p), -100.0)
                + (1.0 - t) * jnp.maximum(jnp.log(1.0 - p), -100.0))
    pt = jnp.exp(-bce)
    alpha_t = alpha * t + (1.0 - alpha) * (1.0 - t)
    focal = alpha_t * (1.0 - pt) ** gamma * bce
    if reduction == "none":
        return focal
    if reduction == "sum":
        return jnp.sum(focal)
    return jnp.mean(focal)


if __name__ == "__main__":
    key = jax.random.PRNGKey(0)
    k1, k2, k3, k4 = jax.random.split(key, 4)
    ok = True

    # Case 1: probabilities (module built with BCELoss), (16, 32).
    B, C = 16, 32
    prediction = jax.nn.sigmoid(jax.random.normal(k1, (B, C), dtype=jnp.float32))
    target = (jax.random.uniform(k2, (B, C)) > 0.5).astype(jnp.float32)
    for reduction in ("none", "sum", "mean"):
        out = jax.block_until_ready(
            binary_focal_loss(prediction, target, alpha=0.25, gamma=2.0,
                              reduction=reduction, with_logits=False))
        ref = _reference(prediction, target, alpha=0.25, gamma=2.0,
                         reduction=reduction, with_logits=False)
        ok = ok and bool(jnp.allclose(out, ref, rtol=1e-5, atol=1e-5))

    # Non-integer gamma exercises the exp(gamma*log(x)) path.
    out = jax.block_until_ready(
        binary_focal_loss(prediction, target, alpha=0.25, gamma=2.5,
                          reduction="sum", with_logits=False))
    ref = _reference(prediction, target, alpha=0.25, gamma=2.5,
                     reduction="sum", with_logits=False)
    ok = ok and bool(jnp.allclose(out, ref, rtol=1e-5, atol=1e-5))

    # Case 2: logits path (BCEWithLogitsLoss), ragged batch -> multi-block
    # grid with a partial (masked) last block; small block just for the test.
    B2, C2 = 41, 50
    logits2 = jax.random.normal(k3, (B2, C2), dtype=jnp.float32)
    target2 = (jax.random.uniform(k4, (B2, C2)) > 0.5).astype(jnp.float32)
    for reduction in ("none", "sum", "mean"):
        out = jax.block_until_ready(
            binary_focal_loss(logits2, target2, alpha=0.4, gamma=3.0,
                              reduction=reduction, with_logits=True,
                              max_rows_per_block=8))
        ref = _reference(logits2, target2, alpha=0.4, gamma=3.0,
                         reduction=reduction, with_logits=True)
        ok = ok and bool(jnp.allclose(out, ref, rtol=1e-5, atol=1e-5))

    print("KERNEL_OK" if ok else "KERNEL_MISMATCH")
</pallas_src>

<mosaic_0001>
module attributes {stable_mosaic.version = 11 : i64} {
  func.func @_elementwise_kernel(%arg0: i32, %arg1: memref<16x32xf32, #tpu.memory_space<vmem>>, %arg2: memref<16x32xf32, #tpu.memory_space<vmem>>, %arg3: memref<16x32xf32, #tpu.memory_space<vmem>>) attributes {dimension_semantics = [#tpu.dimension_semantics<parallel>], iteration_bounds = array<i64: 1>, scalar_prefetch = 0 : i64, scratch_operands = 0 : i64, tpu.core_type = #tpu.core_type<tc>, window_params = [{transform_indices = @transform_0, window_bounds = array<i64: 16, 32>}, {transform_indices = @transform_1, window_bounds = array<i64: 16, 32>}, {transform_indices = @transform_2, window_bounds = array<i64: 16, 32>}]} {
    %c0 = arith.constant 0 : index
    %c0_0 = arith.constant 0 : index
    %0 = vector.load %arg1[%c0, %c0_0] : memref<16x32xf32, #tpu.memory_space<vmem>>, vector<16x32xf32>
    %c0_1 = arith.constant 0 : index
    %c0_2 = arith.constant 0 : index
    %1 = vector.load %arg2[%c0_1, %c0_2] : memref<16x32xf32, #tpu.memory_space<vmem>>, vector<16x32xf32>
    %2 = arith.mulf %1, %0 : vector<16x32xf32>
    %cst = arith.constant 1.000000e+00 : f32
    %3 = vector.broadcast %cst : f32 to vector<16x32xf32>
    %4 = arith.subf %3, %1 : vector<16x32xf32>
    %cst_3 = arith.constant 1.000000e+00 : f32
    %5 = vector.broadcast %cst_3 : f32 to vector<16x32xf32>
    %6 = arith.subf %5, %0 : vector<16x32xf32>
    %7 = arith.mulf %4, %6 : vector<16x32xf32>
    %8 = arith.addf %2, %7 : vector<16x32xf32>
    %9 = math.log %8 : vector<16x32xf32>
    %cst_4 = arith.constant -1.000000e+02 : f32
    %10 = vector.broadcast %cst_4 : f32 to vector<16x32xf32>
    %11 = arith.maximumf %9, %10 : vector<16x32xf32>
    %cst_5 = arith.constant 0.000000e+00 : f32
    %12 = vector.broadcast %cst_5 : f32 to vector<16x32xf32>
    %13 = arith.subf %12, %11 : vector<16x32xf32>
    %cst_6 = arith.constant 1.000000e+00 : f32
    %14 = vector.broadcast %cst_6 : f32 to vector<16x32xf32>
    %15 = arith.subf %14, %8 : vector<16x32xf32>
    %cst_7 = arith.constant 2.500000e-01 : f32
    %16 = vector.broadcast %cst_7 : f32 to vector<16x32xf32>
    %17 = arith.mulf %16, %1 : vector<16x32xf32>
    %cst_8 = arith.constant 1.000000e+00 : f32
    %18 = vector.broadcast %cst_8 : f32 to vector<16x32xf32>
    %19 = arith.subf %18, %1 : vector<16x32xf32>
    %cst_9 = arith.constant 7.500000e-01 : f32
    %20 = vector.broadcast %cst_9 : f32 to vector<16x32xf32>
    %21 = arith.mulf %20, %19 : vector<16x32xf32>
    %22 = arith.addf %17, %21 : vector<16x32xf32>
    %23 = arith.mulf %15, %15 : vector<16x32xf32>
    %24 = arith.mulf %22, %23 : vector<16x32xf32>
    %25 = arith.mulf %24, %13 : vector<16x32xf32>
    %c0_10 = arith.constant 0 : index
    %c0_11 = arith.constant 0 : index
    %26 = vector.load %arg3[%c0_10, %c0_11] : memref<16x32xf32, #tpu.memory_space<vmem>>, vector<16x32xf32>
    tpu.vector_store %arg3[%c0_10, %c0_11], %25 {strides = array<i32>} : memref<16x32xf32, #tpu.memory_space<vmem>>, vector<16x32xf32>,
    return
  }
  func.func @transform_0(%arg0: i32) -> (i32, i32) {
    %c0_i32 = arith.constant 0 : i32
    %c0_i32_0 = arith.constant 0 : i32
    return %arg0, %c0_i32 : i32, i32
  }
  func.func @transform_1(%arg0: i32) -> (i32, i32) {
    %c0_i32 = arith.constant 0 : i32
    %c0_i32_0 = arith.constant 0 : i32
    return %arg0, %c0_i32 : i32, i32
  }
  func.func @transform_2(%arg0: i32) -> (i32, i32) {
    %c0_i32 = arith.constant 0 : i32
    %c0_i32_0 = arith.constant 0 : i32
    return %arg0, %c0_i32 : i32, i32
  }
}

</mosaic_0001>

<bundles_post_ra>
// kernel: tpu_custom_call.1
= control target key start
LH: loop header
LB: loop body
LE: loop exit
PB: predicated region body
PF: predicated region fallthrough
CT: control target
= control target key end

     0   :  { %7 = vsyncpa [#allocation3], 0  ;;  %s210_s0 = inlined_call_operand.hbm [shape: f32[16,32], index: 0, kind: input, shape index: {}]   ;;  %s211_s1 = inlined_call_operand.hbm [shape: f32[16,32], index: 1, kind: input, shape index: {}]   ;;  %s212_s2 = inlined_call_operand.hbm [shape: f32[16,32], index: 2, kind: output, shape index: {}]  }
   0x1   :  { %8 = vsyncpa [#allocation6], 0 }
   0x2   :  { %9 = vsyncpa [#allocation4], 0  ;;  %s172_s9 = smov [#allocation2]  }
   0x3   :  { %s15_s10 = sshll.u32 %s172_s9, 4  ;;  %s16_s10 = int_to_ptr.vmem [resolvable:$true] %s15_s10 }
   0x4   :  { %s114_s11 = scalar_lea.vmem %s16_s10, 256  ;;  %p119_p1 = scmp.lt.s32.totalorder %s16_s10, %s16_s10 }
   0x5   :  { %p115_p0 = scmp.ne.s32.totalorder %s16_s10, %s114_s11  ;;  %p120_p2 = scmp.lt.s32.totalorder %s114_s11, %s114_s11 }
   0x7   :  { %p121_p3 = por %p120_p2, %p119_p1 }
   0x9   :  { %p122_p4 = pnand %p121_p3, %p115_p0 }
   0xb   :  { %125 = shalt.err (!%p122_p4)
}
   0xc   :  { %s173_s12 = smov 128   ;;  %s174_s13 = smov 8  }
   0xd   :  { %21 = dma.hbm_to_vmem [thread:$0]  %s210_s0, 256, %s16_s10, [#allocation3], %s173_s12, %s173_s12, %s174_s13  }
   0xe   :  { %s175_s16 = smov [#allocation5]  }
   0xf   :  { %s27_s17 = sshll.u32 %s175_s16, 4  ;;  %s28_s17 = int_to_ptr.vmem [resolvable:$true] %s27_s17 }
  0x10   :  { %s134_s18 = scalar_lea.vmem %s28_s17, 256  ;;  %p139_p6 = scmp.lt.s32.totalorder %s28_s17, %s28_s17 }
  0x11   :  { %p135_p5 = scmp.ne.s32.totalorder %s28_s17, %s134_s18  ;;  %p140_p7 = scmp.lt.s32.totalorder %s134_s18, %s134_s18 }
  0x13   :  { %p141_p8 = por %p140_p7, %p139_p6 }
  0x15   :  { %p142_p9 = pnand %p141_p8, %p135_p5 }
  0x17   :  { %145 = shalt.err (!%p142_p9)
}
  0x18   :  { %33 = dma.hbm_to_vmem [thread:$0]  %s211_s1, 256, %s28_s17, [#allocation6], %s173_s12, %s173_s12, %s174_s13  }
  0x19   :  { %166 = dma.done.wait [#allocation3], 256  }
  0x1a   :  { %167 = vsyncadd [#allocation3], 4294967040 }
  0x1b   :  { %168 = dma.done.wait [#allocation6], 256  }
  0x1c   :  { %169 = vsyncadd [#allocation6], 4294967040  ;;  %v40_v0 = vld [vmem:[#allocation2] sm:$0xff]  ;;  %v42_v1 = vld [vmem:[#allocation5] sm:$0xff]  ;;  %s176_s0 = smov [#allocation7]   ;;  %vm76_vm0 = vcmask 261120  }
  0x1d   :  { %v41_v2 = vld [vmem:[#allocation2 + $0x8] sm:$0xff]  ;;  %v44_v3 = vmul.f32 %v42_v1, %v40_v0  ;;  %v46_v4 = vsub.f32 1.0, %v42_v1  ;;  %v48_v5 = vsub.f32 1.0, %v40_v0  ;;  %v43_v6 = vld [vmem:[#allocation5 + $0x8] sm:$0xff]  ;;  %v64_v15 = vmul.f32 0.25, %v42_v1  ;;  %s84_s1 = sshll.u32 %s176_s0, 4  ;;  %s85_s1 = int_to_ptr.vmem [resolvable:$true] %s84_s1 }
  0x1e   :  { %v45_v7 = vmul.f32 %v43_v6, %v41_v2  ;;  %v47_v8 = vsub.f32 1.0, %v43_v6  ;;  %v49_v9 = vsub.f32 1.0, %v41_v2  ;;  %v65_v18 = vmul.f32 0.25, %v43_v6  ;;  %s146_s21 = scalar_lea.vmem %s85_s1, 256  ;;  %p151_p11 = scmp.lt.s32.totalorder %s85_s1, %s85_s1 }
  0x1f   :  { %v50_v10 = vmul.f32 %v48_v5, %v46_v4  ;;  %v66_v16 = vmul.f32 0.75, %v46_v4  ;;  %p147_p10 = scmp.ne.s32.totalorder %s85_s1, %s146_s21  ;;  %p152_p12 = scmp.lt.s32.totalorder %s146_s21, %s146_s21 }
  0x20   :  { %v51_v11 = vmul.f32 %v49_v9, %v47_v8  ;;  %v67_v19 = vmul.f32 0.75, %v47_v8 }
  0x21   :  { %v52_v12 = vadd.f32 %v50_v10, %v44_v3  ;;  %v68_v20 = vadd.f32 %v66_v16, %v64_v15  ;;  %p153_p13 = por %p152_p12, %p151_p11 }
  0x22   :  { %v53_v13 = vadd.f32 %v51_v11, %v45_v7  ;;  %v69_v23 = vadd.f32 %v67_v19, %v65_v18 }
  0x23   :  { %102 = vlog2.f32 %v52_v12  ;;  %v62_v14 = vsub.f32 1.0, %v52_v12  ;;  %p154_p0 = pnand %p153_p13, %p147_p10 }
  0x24   :  { %104 = vlog2.f32 %v53_v13  ;;  %v63_v17 = vsub.f32 1.0, %v53_v13 }
  0x25   :  { %v70_v21 = vmul.f32 %v62_v14, %v62_v14 }
  0x26   :  { %v71_v24 = vmul.f32 %v63_v17, %v63_v17 }
  0x27   :  { %v72_v29 = vmul.f32 %v70_v21, %v68_v20 }
  0x28   :  { %v73_v31 = vmul.f32 %v71_v24, %v69_v23 }
  0x30   :  { %v103_v22 = vpop.eup %102 }
  0x31   :  { %v105_v25 = vpop.eup %104  ;;  %v55_v26 = vmul.f32 0.6931472, %v103_v22 }
  0x32   :  { %v57_v27 = vmul.f32 0.6931472, %v105_v25 }
  0x33   :  { %v58_v28 = vmax.f32 %v55_v26, -100.0 }
  0x34   :  { %v59_v30 = vmax.f32 %v57_v27, -100.0 }
  0x35   :  { %v60_v32 = vsub.f32 0.0, %v58_v28 }
  0x36   :  { %v61_v33 = vsub.f32 0.0, %v59_v30 }
  0x37   :  { %v74_v34 = vmul.f32 %v72_v29, %v60_v32 }
  0x38   :  { %v75_v35 = vmul.f32 %v73_v31, %v61_v33 }
  0x39   :  { %77 = vst.msk [vmem:[#allocation7] sm:$0xff] %vm76_vm0, %v74_v34 }
  0x3a   :  { %78 = vst.msk [vmem:[#allocation7 + $0x8] sm:$0xff] %vm76_vm0, %v75_v35 }
  0x3b   :  { %157 = shalt.err (!%p154_p0)
}
  0x3c   :  { %90 = dma.vmem_to_hbm [thread:$0]  %s85_s1, 256, %s212_s2, [#allocation4], %s173_s12, %s173_s12, %s174_s13  }
  0x3d   :  { %170 = dma.done.wait [#allocation4], 256  }
  0x3e   :  { %171 = vsyncadd [#allocation4], 4294967040 }
  0x3f   :  { %94 = vsyncpa [#allocation3], 1 }
  0x40   :  { %95 = vsyncpa [#allocation6], 1 }
  0x41   :  { %96 = vsyncpa [#allocation4], 1 }

</bundles_post_ra>
